<compile_context>
chip_gen: v7x
topology: tpu7x:2x2x1
jax: 0.10.0
libtpu: 0.0.40
codegen_flags: <defaults>
</compile_context>

<pallas_src>
import functools
import math

import jax
import jax.numpy as jnp
from jax import lax
from jax.experimental import pallas as pl
from jax.experimental.pallas import tpu as pltpu


# ---------------------------------------------------------------------------
# Kernels
# ---------------------------------------------------------------------------

def _attn_kernel_single(q_ref, k_ref, v_ref, o_ref, *, hb, ch, scale2,
                        bf16_exp, approx_recip):
    """Fast path: the whole KV axis is one tile (no online-softmax state)."""
    tq = q_ref.shape[-1]
    tk = k_ref.shape[-1]

    q = q_ref[0].reshape(hb, ch, tq)                      # native dtype
    # Softmax scale folded into k: ch*tk multiplies instead of tk*tq.
    k = k_ref[0].reshape(hb, ch, tk) * scale2
    v = v_ref[0].reshape(hb, ch, tk)

    # Transposed scores: s[h, kv, t]; T stays on lanes, softmax axis on sublanes.
    s = lax.dot_general(k, q,
                        dimension_numbers=(((1,), (1,)), ((0,), (0,))),
                        preferred_element_type=jnp.float32)      # [hb, tk, tq]

    m = jnp.max(s, axis=1, keepdims=True)                        # [hb, 1, tq]
    if bf16_exp:
        p = jnp.exp((s - m).astype(jnp.bfloat16))                # bf16 EUP
        l = jnp.sum(p, axis=1, keepdims=True, dtype=jnp.float32)
    else:
        p = jnp.exp(s - m)
        l = jnp.sum(p, axis=1, keepdims=True)

    pv = lax.dot_general(v, p.astype(v_ref.dtype),
                         dimension_numbers=(((2,), (1,)), ((0,), (0,))),
                         preferred_element_type=jnp.float32)     # [hb, ch, tq]

    inv = pl.reciprocal(l, approx=True) if approx_recip else (1.0 / l)
    o_ref[0] = (pv * inv).reshape(hb * ch, tq).astype(o_ref.dtype)


def _attn_kernel_flash(q_ref, k_ref, v_ref, o_ref, m_sc, l_sc, acc_sc, *,
                       hb, ch, scale2, bf16_exp, approx_recip):
    """Flash path: KV tiles accumulated on the last ('arbitrary') grid axis."""
    kv_step = pl.program_id(3)
    tq = q_ref.shape[-1]
    tk = k_ref.shape[-1]

    @pl.when(kv_step == 0)
    def _init():
        m_sc[...] = jnp.full(m_sc.shape, -jnp.inf, dtype=jnp.float32)
        l_sc[...] = jnp.zeros(l_sc.shape, dtype=jnp.float32)

    q = q_ref[0].reshape(hb, ch, tq)
    k = k_ref[0].reshape(hb, ch, tk) * scale2            # scale on k, not scores
    v = v_ref[0].reshape(hb, ch, tk)

    s = lax.dot_general(k, q,
                        dimension_numbers=(((1,), (1,)), ((0,), (0,))),
                        preferred_element_type=jnp.float32)      # [hb, tk, tq]

    m_prev = m_sc[...]                                            # [hb, 1, tq]
    m_new = jnp.maximum(m_prev, jnp.max(s, axis=1, keepdims=True))
    alpha = jnp.exp(m_prev - m_new)                               # [hb, 1, tq]
    if bf16_exp:
        p = jnp.exp((s - m_new).astype(jnp.bfloat16))             # [hb, tk, tq]
        p_sum = jnp.sum(p, axis=1, keepdims=True, dtype=jnp.float32)
    else:
        p = jnp.exp(s - m_new)
        p_sum = jnp.sum(p, axis=1, keepdims=True)
    l_sc[...] = alpha * l_sc[...] + p_sum

    pv = lax.dot_general(v, p.astype(v_ref.dtype),
                         dimension_numbers=(((2,), (1,)), ((0,), (0,))),
                         preferred_element_type=jnp.float32)      # [hb, ch, tq]

    @pl.when(kv_step == 0)
    def _first():
        acc_sc[...] = pv                       # no zero-init + multiply-by-zero

    @pl.when(kv_step > 0)
    def _rest():
        acc_sc[...] = alpha * acc_sc[...] + pv

    m_sc[...] = m_new

    @pl.when(kv_step == pl.num_programs(3) - 1)
    def _finalize():
        l = l_sc[...]
        inv = pl.reciprocal(l, approx=True) if approx_recip else (1.0 / l)
        o_ref[0] = (acc_sc[...] * inv).reshape(hb * ch, tq).astype(o_ref.dtype)


# ---------------------------------------------------------------------------
# Generation-aware sizing helpers
# ---------------------------------------------------------------------------

def _device_kind():
    try:
        return jax.devices()[0].device_kind.lower()
    except Exception:
        return ""


def _tpu_generation(kind):
    for g in (7, 6, 5, 4, 3, 2):
        if f"v{g}" in kind or f"tpu{g}" in kind:
            return g
    return 0


def _vmem_physical_bytes(gen):
    try:
        info = pltpu.get_tpu_info()
        for attr in ("vmem_capacity_bytes", "vmem_bytes", "vmem_size_bytes"):
            cap = getattr(info, attr, None)
            if cap:
                return int(cap)
    except Exception:
        pass
    if gen >= 7:
        return 64 << 20          # v7x: 64 MiB per TensorCore
    if gen in (5, 6):
        return 128 << 20         # v5e / v6e
    return 64 << 20              # unknown: conservative


def _default_scoped_limit(gen):
    return (32 << 20) if gen >= 6 else (16 << 20)


def _vmem_estimate(hb, ch, tq, tk, itemsize, bf16_exp):
    q_b = 2 * hb * ch * tq * itemsize            # q block (double-buffered)
    kv_b = 2 * 2 * hb * ch * tk * itemsize       # k + v blocks (double-buffered)
    out_b = 2 * hb * ch * tq * itemsize          # output block
    s_b = hb * tk * tq * 4                       # f32 scores
    p_b = hb * tk * tq * (2 if bf16_exp else 4)  # probabilities
    acc_b = hb * ch * tq * 4                     # f32 accumulator
    ml_b = 2 * hb * 8 * tq * 4                   # m / l (sublane padded)
    return q_b + kv_b + out_b + s_b + p_b + acc_b + ml_b


def _tile_candidates(total, cap):
    """Multiples of 128 that divide `total`, <= cap, descending."""
    return sorted((d for d in range(128, min(total, cap) + 1, 128)
                   if total % d == 0), reverse=True)


def _choose_tiling(t_len, ch, itemsize, gen, bf16_exp, budget):
    if t_len % 128 != 0:
        # TODO(synk): pad/mask the KV axis for very large T that is not a
        # multiple of 128; a tile must be 128-divisible or equal the full dim.
        return t_len, t_len
    tq_cands = _tile_candidates(t_len, 512) or [t_len]
    tk_cap = 512 if gen >= 7 else 1024           # smaller f32 score block on v7x
    tk_cands = _tile_candidates(t_len, tk_cap) or [t_len]
    qi, ki = 0, 0
    tq, tk = tq_cands[qi], tk_cands[ki]
    # Shrink the kv tile first, then the query tile, until hb=1 fits the budget.
    while _vmem_estimate(1, ch, tq, tk, itemsize, bf16_exp) > budget:
        if ki + 1 < len(tk_cands):
            ki += 1
            tk = tk_cands[ki]
        elif qi + 1 < len(tq_cands):
            qi += 1
            tq = tq_cands[qi]
        else:
            break
    return tq, tk


def _pick_head_block(n_heads, ch, tq, tk, itemsize, bf16_exp, budget, max_hb):
    hb = 1
    for cand in range(1, min(n_heads, max_hb) + 1):
        if n_heads % cand != 0:
            continue
        if _vmem_estimate(cand, ch, tq, tk, itemsize, bf16_exp) <= budget:
            hb = cand
    return hb


# ---------------------------------------------------------------------------
# Wrapper
# ---------------------------------------------------------------------------

def single_modal_qkv_attention(qkv, n_heads, *, tile_override=None):
    """qkv: [N, 3*H*C, T] -> [N, H*C, T], matching the PyTorch module."""
    bs, width, length = qkv.shape
    assert width % (3 * n_heads) == 0
    ch = width // (3 * n_heads)
    # TODO(synk): support head dims that are not a multiple of 8 (needs masked
    # channel blocks); typical attention head widths (16/32/64/...) satisfy this.
    assert ch % 8 == 0, "head channel dim must be a multiple of 8 for the TPU kernel"

    scale2 = 1.0 / math.sqrt(ch)          # == (1/sqrt(sqrt(ch)))**2, applied to k
    itemsize = jnp.dtype(qkv.dtype).itemsize

    kind = _device_kind()
    gen = _tpu_generation(kind)
    phys = _vmem_physical_bytes(gen)
    default_scoped = _default_scoped_limit(gen)

    is_bf16 = qkv.dtype == jnp.bfloat16
    bf16_exp = is_bf16 and gen >= 6       # bf16 EUP only on v6e / v7x
    approx_recip = is_bf16

    budget = int(phys * 0.4)
    if tile_override is not None:
        tq, tk = tile_override
    else:
        tq, tk = _choose_tiling(length, ch, itemsize, gen, bf16_exp, budget)
    assert length % tq == 0 and length % tk == 0
    n_q = length // tq
    n_kv = length // tk

    max_hb = n_heads
    if gen >= 7 and bs * n_q < 2 and n_heads >= 2:
        max_hb = n_heads // 2              # keep >=2 parallel blocks for 2 TCs
    hb = _pick_head_block(n_heads, ch, tq, tk, itemsize, bf16_exp, budget, max_hb)
    n_groups = n_heads // hb

    est = _vmem_estimate(hb, ch, tq, tk, itemsize, bf16_exp)
    cp_kwargs = {}
    if est > default_scoped:
        cp_kwargs["vmem_limit_bytes"] = int(
            min(max(est * 1.25, default_scoped + (1 << 20)), phys * 0.8))

    out_shape = jax.ShapeDtypeStruct((bs, n_heads * ch, length), qkv.dtype)

    if n_kv == 1:
        kernel = functools.partial(
            _attn_kernel_single, hb=hb, ch=ch, scale2=scale2,
            bf16_exp=bf16_exp, approx_recip=approx_recip)
        grid_spec = pltpu.PrefetchScalarGridSpec(
            num_scalar_prefetch=0,
            grid=(bs, n_groups, n_q),
            in_specs=[
                # q / k / v channel blocks of the SAME qkv array (no wrapper split).
                pl.BlockSpec((1, hb * ch, tq), lambda n, g, t: (n, g, t)),
                pl.BlockSpec((1, hb * ch, length),
                             lambda n, g, t: (n, n_groups + g, 0)),
                pl.BlockSpec((1, hb * ch, length),
                             lambda n, g, t: (n, 2 * n_groups + g, 0)),
            ],
            out_specs=pl.BlockSpec((1, hb * ch, tq), lambda n, g, t: (n, g, t)),
        )
        dims = ("parallel", "parallel", "parallel")
    else:
        kernel = functools.partial(
            _attn_kernel_flash, hb=hb, ch=ch, scale2=scale2,
            bf16_exp=bf16_exp, approx_recip=approx_recip)
        grid_spec = pltpu.PrefetchScalarGridSpec(
            num_scalar_prefetch=0,
            grid=(bs, n_groups, n_q, n_kv),
            in_specs=[
                pl.BlockSpec((1, hb * ch, tq), lambda n, g, t, s: (n, g, t)),
                pl.BlockSpec((1, hb * ch, tk),
                             lambda n, g, t, s: (n, n_groups + g, s)),
                pl.BlockSpec((1, hb * ch, tk),
                             lambda n, g, t, s: (n, 2 * n_groups + g, s)),
            ],
            out_specs=pl.BlockSpec((1, hb * ch, tq), lambda n, g, t, s: (n, g, t)),
            scratch_shapes=[
                pltpu.VMEM((hb, 1, tq), jnp.float32),    # running max
                pltpu.VMEM((hb, 1, tq), jnp.float32),    # running denominator
                pltpu.VMEM((hb, ch, tq), jnp.float32),   # output accumulator
            ],
        )
        dims = ("parallel", "parallel", "parallel", "arbitrary")

    return pl.pallas_call(
        kernel,
        out_shape=out_shape,
        grid_spec=grid_spec,
        compiler_params=pltpu.CompilerParams(dimension_semantics=dims, **cp_kwargs),
    )(qkv, qkv, qkv)


# ---------------------------------------------------------------------------
# Pure-JAX reference (mirrors the PyTorch forward line by line)
# ---------------------------------------------------------------------------

def _reference(qkv, n_heads):
    bs, width, length = qkv.shape
    ch = width // (3 * n_heads)
    q, k, v = jnp.split(qkv, 3, axis=1)
    scale = 1.0 / math.sqrt(math.sqrt(ch))
    qh = (q * scale).reshape(bs * n_heads, ch, length)
    kh = (k * scale).reshape(bs * n_heads, ch, length)
    vh = v.reshape(bs * n_heads, ch, length)
    weight = jnp.einsum("bct,bcs->bts", qh, kh)
    weight = jax.nn.softmax(weight.astype(jnp.float32), axis=-1).astype(weight.dtype)
    a = jnp.einsum("bts,bcs->bct", weight, vh)
    return a.reshape(bs, -1, length)


if __name__ == "__main__":
    key = jax.random.PRNGKey(0)

    # --- Case 1: small shapes, f32, single-KV fast path ---------------------
    n_heads, N, C, T = 2, 2, 16, 8            # qkv width = 3 * H * C = 96
    qkv = jax.random.normal(key, (N, 3 * n_heads * C, T), dtype=jnp.float32)
    out = jax.block_until_ready(single_modal_qkv_attention(qkv, n_heads))
    ref = _reference(qkv, n_heads)
    assert out.shape == (N, n_heads * C, T)
    assert jnp.allclose(out, ref, atol=1e-5, rtol=1e-5), \
        float(jnp.max(jnp.abs(out - ref)))

    # --- Case 2: bf16 path (MXU-native operands, approx reciprocal) ---------
    qkv_bf16 = qkv.astype(jnp.bfloat16)
    out_bf = jax.block_until_ready(single_modal_qkv_attention(qkv_bf16, n_heads))
    ref_bf = _reference(qkv_bf16, n_heads).astype(jnp.float32)
    assert out_bf.shape == (N, n_heads * C, T)
    assert jnp.allclose(out_bf.astype(jnp.float32), ref_bf, atol=5e-2, rtol=5e-2)

    # --- Case 3: flash path (query + kv tiling) at small cost, f32 ----------
    n_heads3, N3, C3, T3 = 2, 1, 32, 256
    qkv3 = jax.random.normal(jax.random.PRNGKey(0),
                             (N3, 3 * n_heads3 * C3, T3), dtype=jnp.float32)
    out3 = jax.block_until_ready(
        single_modal_qkv_attention(qkv3, n_heads3, tile_override=(128, 128)))
    ref3 = _reference(qkv3, n_heads3)
    assert out3.shape == (N3, n_heads3 * C3, T3)
    assert jnp.allclose(out3, ref3, atol=1e-4, rtol=1e-4), \
        float(jnp.max(jnp.abs(out3 - ref3)))

    print("KERNEL_OK")
</pallas_src>

<mosaic_0001>
module attributes {stable_mosaic.version = 11 : i64} {
  func.func @_attn_kernel_single(%arg0: i32, %arg1: i32, %arg2: i32, %arg3: memref<1x32x8xf32, #tpu.memory_space<vmem>>, %arg4: memref<1x32x8xf32, #tpu.memory_space<vmem>>, %arg5: memref<1x32x8xf32, #tpu.memory_space<vmem>>, %arg6: memref<1x32x8xf32, #tpu.memory_space<vmem>>) attributes {dimension_semantics = [#tpu.dimension_semantics<parallel>, #tpu.dimension_semantics<parallel>, #tpu.dimension_semantics<parallel>], iteration_bounds = array<i64: 2, 1, 1>, scalar_prefetch = 0 : i64, scratch_operands = 0 : i64, tpu.core_type = #tpu.core_type<tc>, window_params = [{transform_indices = @transform_0, window_bounds = array<i64: 1, 32, 8>}, {transform_indices = @transform_1, window_bounds = array<i64: 1, 32, 8>}, {transform_indices = @transform_2, window_bounds = array<i64: 1, 32, 8>}, {transform_indices = @transform_3, window_bounds = array<i64: 1, 32, 8>}]} {
    %c0 = arith.constant 0 : index
    %c0_0 = arith.constant 0 : index
    %c0_1 = arith.constant 0 : index
    %0 = vector.load %arg3[%c0, %c0_0, %c0_1] : memref<1x32x8xf32, #tpu.memory_space<vmem>>, vector<1x32x8xf32>
    %1 = vector.shape_cast %0 : vector<1x32x8xf32> to vector<32x8xf32>
    %2 = vector.shape_cast %1 : vector<32x8xf32> to vector<2x16x8xf32>
    %c0_2 = arith.constant 0 : index
    %c0_3 = arith.constant 0 : index
    %c0_4 = arith.constant 0 : index
    %3 = vector.load %arg4[%c0_2, %c0_3, %c0_4] : memref<1x32x8xf32, #tpu.memory_space<vmem>>, vector<1x32x8xf32>
    %4 = vector.shape_cast %3 : vector<1x32x8xf32> to vector<32x8xf32>
    %5 = vector.shape_cast %4 : vector<32x8xf32> to vector<2x16x8xf32>
    %cst = arith.constant 2.500000e-01 : f32
    %6 = vector.broadcast %cst : f32 to vector<2x16x8xf32>
    %7 = arith.mulf %5, %6 : vector<2x16x8xf32>
    %c0_5 = arith.constant 0 : index
    %c0_6 = arith.constant 0 : index
    %c0_7 = arith.constant 0 : index
    %8 = vector.load %arg5[%c0_5, %c0_6, %c0_7] : memref<1x32x8xf32, #tpu.memory_space<vmem>>, vector<1x32x8xf32>
    %9 = vector.shape_cast %8 : vector<1x32x8xf32> to vector<32x8xf32>
    %10 = vector.shape_cast %9 : vector<32x8xf32> to vector<2x16x8xf32>
    %cst_8 = arith.constant dense<0.000000e+00> : vector<2x8x8xf32>
    %11 = tpu.matmul %7, %2, %cst_8 {dimension_numbers = #tpu.dot_dimension_numbers<[1], [1], [2], [2], [0, 0, 0, 2, 1, 2], [0], [0]>} : vector<2x16x8xf32>, vector<2x16x8xf32>, vector<2x8x8xf32> -> vector<2x8x8xf32>
    %cst_9 = arith.constant dense<0xFF800000> : vector<2x8xf32>
    %12 = vector.multi_reduction <maximumf>, %11, %cst_9 [1] : vector<2x8x8xf32> to vector<2x8xf32>
    %13 = vector.shape_cast %12 : vector<2x8xf32> to vector<2x1x8xf32>
    %14 = vector.broadcast %13 : vector<2x1x8xf32> to vector<2x8x8xf32>
    %15 = arith.subf %11, %14 : vector<2x8x8xf32>
    %16 = math.exp %15 : vector<2x8x8xf32>
    %cst_10 = arith.constant dense<0.000000e+00> : vector<2x8xf32>
    %17 = vector.multi_reduction <add>, %16, %cst_10 [1] : vector<2x8x8xf32> to vector<2x8xf32>
    %18 = vector.shape_cast %17 : vector<2x8xf32> to vector<2x1x8xf32>
    %cst_11 = arith.constant dense<0.000000e+00> : vector<2x16x8xf32>
    %19 = tpu.matmul %10, %16, %cst_11 {dimension_numbers = #tpu.dot_dimension_numbers<[2], [1], [1], [2], [0, 0, 0, 1, 1, 2], [0], [0]>} : vector<2x16x8xf32>, vector<2x8x8xf32>, vector<2x16x8xf32> -> vector<2x16x8xf32>
    %cst_12 = arith.constant 1.000000e+00 : f32
    %20 = vector.broadcast %cst_12 : f32 to vector<2x1x8xf32>
    %21 = arith.divf %20, %18 : vector<2x1x8xf32>
    %22 = vector.broadcast %21 : vector<2x1x8xf32> to vector<2x16x8xf32>
    %23 = arith.mulf %19, %22 : vector<2x16x8xf32>
    %24 = vector.shape_cast %23 : vector<2x16x8xf32> to vector<32x8xf32>
    %c0_13 = arith.constant 0 : index
    %c0_14 = arith.constant 0 : index
    %c0_15 = arith.constant 0 : index
    %25 = vector.load %arg6[%c0_13, %c0_14, %c0_15] : memref<1x32x8xf32, #tpu.memory_space<vmem>>, vector<1x32x8xf32>
    %26 = vector.shape_cast %25 : vector<1x32x8xf32> to vector<32x8xf32>
    %27 = vector.shape_cast %24 : vector<32x8xf32> to vector<1x32x8xf32>
    tpu.vector_store %arg6[%c0_13, %c0_14, %c0_15], %27 {strides = array<i32>} : memref<1x32x8xf32, #tpu.memory_space<vmem>>, vector<1x32x8xf32>,
    return
  }
  func.func @transform_0(%arg0: i32, %arg1: i32, %arg2: i32) -> (i32, i32, i32) {
    %c0_i32 = arith.constant 0 : i32
    return %arg0, %arg1, %arg2 : i32, i32, i32
  }
  func.func @transform_1(%arg0: i32, %arg1: i32, %arg2: i32) -> (i32, i32, i32) {
    %c1_i32 = arith.constant 1 : i32
    %0 = arith.addi %c1_i32, %arg1 : i32
    %c0_i32 = arith.constant 0 : i32
    %c0_i32_0 = arith.constant 0 : i32
    return %arg0, %0, %c0_i32 : i32, i32, i32
  }
  func.func @transform_2(%arg0: i32, %arg1: i32, %arg2: i32) -> (i32, i32, i32) {
    %c2_i32 = arith.constant 2 : i32
    %0 = arith.addi %c2_i32, %arg1 : i32
    %c0_i32 = arith.constant 0 : i32
    %c0_i32_0 = arith.constant 0 : i32
    return %arg0, %0, %c0_i32 : i32, i32, i32
  }
  func.func @transform_3(%arg0: i32, %arg1: i32, %arg2: i32) -> (i32, i32, i32) {
    %c0_i32 = arith.constant 0 : i32
    return %arg0, %arg1, %arg2 : i32, i32, i32
  }
}

</mosaic_0001>

<bundles_post_ra>
// kernel: tpu_custom_call.1
= control target key start
LH: loop header
LB: loop body
LE: loop exit
PB: predicated region body
PF: predicated region fallthrough
CT: control target
= control target key end

     0   :  { %s1047_s12 = smov 0   ;;  %s1049_s13 = smov 0   ;;  %s1113_s0 = inlined_call_operand.vmem [shape: f32[2,96,8], index: 0, kind: input, shape index: {}]   ;;  %s1114_s1 = inlined_call_operand.vmem [shape: f32[2,96,8], index: 1, kind: input, shape index: {}]   ;;  %s1115_s2 = inlined_call_operand.vmem [shape: f32[2,96,8], index: 2, kind: input, shape index: {}]   ;;  %s1116_s3 = inlined_call_operand.vmem [shape: f32[2,32,8], index: 3, kind: output, shape index: {}]  }
   0x1   :  { %s1051_s14 = smov 0  }
   0x2 LB: > { %s32_s15 = sadd.s32 1, %s1018_s13  ;;  %p901_p0 = scmp.ge.s32.totalorder %s1022_s14, 1  ;;  %s1022_s14 = sphi %s1051_s14, %s13_s14   ;;  %s1018_s13 = sphi %s1049_s13, %s1118_s13   ;;  %s1014_s12 = sphi %s1047_s12, %s1117_s12  }
   0x3   : > { %p34_p1 = scmp.ge.s32.totalorder %s32_s15, 2  ;;  %p214_p2 = scmp.lt.s32.totalorder %s1022_s14, 3 }
   0x5   : > { %s1120_s15 = smov (%p34_p1, %s32_s15), 0  ;;  %p215_p3 = pnand %p901_p0, %p214_p2 }
   0x6   : > { %p273_p4 = scmp.lt.s32.totalorder (!%p215_p3), %s1014_s12, 1  ;;  %v1024_v0 = vmov (!%p215_p3), 0.0|0.0   ;;  %vm1025_vm0 = vmmov (!%p215_p3), 0   ;;  %v1026_v1 = vmov (!%p215_p3), 0.0   ;;  %vm370_vm1 = vcmask (!%p215_p3), 130048  }
   0x7   : > { %218 = sbr.rel (%p215_p3) target bundleno = 610 (0x262), region = 32  ;;  %956 = vmatprep.subr.bf16.mxu0 (!%p215_p3), %v1024_v0  ;;  %959 = vmatprep.subr.bf16.mxu1 (!%p215_p3), %v1024_v0  ;;  %vm549_vm2 = vcmask (!%p215_p3), 64512  }
   0x8   : > { %936 = vmatprep.mubr.msk.f32.mxu0 (!%p215_p3), %vm1025_vm0, %v1026_v1  ;;  %943 = vmatprep.mubr.msk.f32.mxu1 (!%p215_p3), %vm1025_vm0, %v1026_v1 }
   0xe   : > { %s1122_s12 = smov (!%p273_p4, %s1014_s12), 1 }
   0xf   : > { %s1068_s16 = smul.u32 96, %s1122_s12  ;;  %s919_s28 = sshll.u32 %s1122_s12, 5 }
  0x10   : > { %s320_s4 = scalar_lea.vmem %s1116_s3, %s919_s28 }
  0x11   : > { %s916_s17 = sadd.s32 32, %s1068_s16  ;;  %s283_s20 = scalar_lea.vmem %s1113_s0, %s1068_s16 }
  0x12   : > { %s294_s23 = scalar_lea.vmem %s1114_s1, %s916_s17  ;;  %v322_v2 = vld [vmem:[%s283_s20] sm:$0xff]  ;;  %v323_v3 = vld [vmem:[%s283_s20 + $0x8] sm:$0xff]  ;;  %v324_v4 = vld [vmem:[%s283_s20 + $0x10] sm:$0xff]  ;;  %s918_s24 = sadd.s32 64, %s1068_s16 }
  0x13   : > { %v328_v5 = vld [vmem:[%s294_s23 + $0x10] sm:$0xff]  ;;  %v326_v6 = vld [vmem:[%s294_s23] sm:$0xff]  ;;  %v329_v7 = vld [vmem:[%s294_s23 + $0x18] sm:$0xff]  ;;  %v957_v8 = vpack.c.bf16 %v323_v3, %v322_v2  ;;  %s1082_s27 = scalar_lea.vmem %s1115_s2, %s918_s24 }
  0x14   : > { %v332_v9 = vmul.f32 0.25, %v328_v5  ;;  %v330_v10 = vmul.f32 0.25, %v326_v6  ;;  %v327_v11 = vld [vmem:[%s294_s23 + $0x8] sm:$0xff]  ;;  %v325_v12 = vld [vmem:[%s283_s20 + $0x18] sm:$0xff]  ;;  %v333_v14 = vmul.f32 0.25, %v329_v7  ;;  %v334_v18 = vld [vmem:[%s1082_s27] sm:$0xff] }
  0x15   : > { %958 = vmatpush3.bf16.msra.mxu0 %v957_v8  ;;  %v960_v13 = vpack.c.bf16 %v325_v12, %v324_v4  ;;  %v331_v15 = vmul.f32 0.25, %v327_v11  ;;  %v336_v19 = vld [vmem:[%s1082_s27 + $0x10] sm:$0xff]  ;;  %v335_v43 = vld [vmem:[%s1082_s27 + $0x8] sm:$0xff]  ;;  %v337_v45 = vld [vmem:[%s1082_s27 + $0x18] sm:$0xff] }
  0x16   : > { %444 = vxpose.xlu1.b32.start [1/2] (short) (narrow) %v332_v9, 8  ;;  %338 = vxpose.xlu0.b32.start [1/2] (short) (narrow) %v330_v10, 8 }
  0x17   : > { %961 = vmatpush3.bf16.msra.mxu1 %v960_v13 }
  0x1a   : > { %445 = vxpose.xlu1.b32.end [2/2] (short) (narrow) %v333_v14, 8  ;;  %339 = vxpose.xlu0.b32.end [2/2] (short) (narrow) %v331_v15, 8 }
  0x96   : > { %v460_v16 = vpop.trf.xlu1  ;;  %v354_v17 = vpop.trf.xlu0 }
  0x97   : > { %937 = vmatmul.mubr.msk.f32.vlgmr.msra.gmra.mrb[0].mxu0 %vm370_vm1, %v354_v17  ;;  %944 = vmatmul.mubr.msk.f32.vlgmr.msra.gmra.mrb[0].mxu1 %vm370_vm1, %v460_v16 }
  0x98   : > { %948 = vmatprep.mubr.msk.f32.mxu0 %vm549_vm2, %v334_v18  ;;  %953 = vmatprep.mubr.msk.f32.mxu1 %vm549_vm2, %v336_v19 }
 0x16a   : > { %v440_v20 = vpop.f32.mrb[0].mxu0  ;;  %v545_v21 = vpop.f32.mrb[0].mxu1 }
 0x16b   : > { %v550_v22 = vsel %vm549_vm2, %v440_v20, -inf  ;;  %v557_v23 = vsel %vm549_vm2, %v545_v21, -inf  ;;  %v938_v24 = vpop.f32.mrb[1].mxu0  ;;  %v945_v25 = vpop.f32.mrb[1].mxu1 }
 0x16c   : > { %v551_v26 = vrot.slane %v550_v22, 4  ;;  %v558_v27 = vrot.slane %v557_v23, 4 }
 0x16e   : > { %v552_v28 = vmax.f32 %v550_v22, %v551_v26  ;;  %v559_v29 = vmax.f32 %v557_v23, %v558_v27 }
 0x170   : > { %v553_v30 = vrot.slane %v552_v28, 2  ;;  %v560_v31 = vrot.slane %v559_v29, 2 }
 0x172   : > { %v554_v32 = vmax.f32 %v552_v28, %v553_v30  ;;  %v561_v33 = vmax.f32 %v559_v29, %v560_v31 }
 0x174   : > { %v555_v34 = vrot.slane %v554_v32, 1  ;;  %v562_v35 = vrot.slane %v561_v33, 1 }
 0x176   : > { %v556_v36 = vmax.f32 %v554_v32, %v555_v34  ;;  %v563_v37 = vmax.f32 %v561_v33, %v562_v35 }
 0x178   : > { %v564_v38 = vsub.f32 %v440_v20, %v556_v36  ;;  %v565_v39 = vsub.f32 %v545_v21, %v563_v37 }
 0x17a   : > { %v566_v40 = vmul.f32 1.442695, %v564_v38  ;;  %v568_v41 = vmul.f32 1.442695, %v565_v39 }
 0x17c   : > { %992 = vpow2.f32 %v566_v40 }
 0x17d   : > { %994 = vpow2.f32 %v568_v41 }
 0x186   : > { %v993_v42 = vpop.eup %992 }
 0x187   : > { %v995_v44 = vpop.eup %994  ;;  %946 = vmatprep.subr.mxu0 %v993_v42  ;;  %v570_v46 = vsel %vm549_vm2, %v993_v42, 0.0 }
 0x188   : > { %951 = vmatprep.subr.mxu1 %v995_v44  ;;  %947 = vmatpush3.msra.mxu0 %v993_v42  ;;  %v577_v47 = vsel %vm549_vm2, %v995_v44, 0.0  ;;  %v571_v48 = vrot.slane %v570_v46, 4 }
 0x189   : > { %952 = vmatpush3.msra.mxu1 %v995_v44  ;;  %949 = vmatmul.mubr.msk.f32.vlgmr.msra.gmra.mrb[2].mxu0 %vm549_vm2, %v335_v43  ;;  %v578_v49 = vrot.slane %v577_v47, 4 }
 0x18a   : > { %954 = vmatmul.mubr.msk.f32.vlgmr.msra.gmra.mrb[2].mxu1 %vm549_vm2, %v337_v45  ;;  %v572_v50 = vadd.f32 %v571_v48, %v570_v46 }
 0x18b   : > { %v579_v51 = vadd.f32 %v578_v49, %v577_v47 }
 0x18c   : > { %v573_v52 = vrot.slane %v572_v50, 2 }
 0x18d   : > { %v580_v53 = vrot.slane %v579_v51, 2 }
 0x18e   : > { %v574_v54 = vadd.f32 %v573_v52, %v572_v50 }
 0x18f   : > { %v581_v55 = vadd.f32 %v580_v53, %v579_v51 }
 0x190   : > { %v575_v56 = vrot.slane %v574_v54, 1 }
 0x191   : > { %v582_v57 = vrot.slane %v581_v55, 1 }
 0x192   : > { %v576_v58 = vadd.f32 %v575_v56, %v574_v54 }
 0x193   : > { %v583_v59 = vadd.f32 %v582_v57, %v581_v55 }
 0x194   : > { %996 = vrcp.f32 %v576_v58 }
 0x195   : > { %998 = vrcp.f32 %v583_v59 }
 0x19e   : > { %v997_v60 = vpop.eup %996 }
 0x19f   : > { %v999_v62 = vpop.eup %998 }
 0x25c   : > { %v950_v61 = vpop.f32.mrb[2].mxu0 }
 0x25d   : > { %v751_v63 = vmul.f32 %v997_v60, %v950_v61  ;;  %v955_v0 = vpop.f32.mrb[2].mxu1  ;;  %v656_v1 = vpop.f32.mrb[3].mxu0 }
 0x25e   : > { %v753_v2 = vmul.f32 %v999_v62, %v955_v0  ;;  %v750_v3 = vmul.f32 %v997_v60, %v656_v1  ;;  %v737_v4 = vpop.f32.mrb[3].mxu1 }
 0x25f   : > { %755 = vst.msk [vmem:[%s320_s4 + $0x8] sm:$0xff] %vm549_vm2, %v751_v63  ;;  %v752_v5 = vmul.f32 %v999_v62, %v737_v4 }
 0x260   : > { %757 = vst.msk [vmem:[%s320_s4 + $0x18] sm:$0xff] %vm549_vm2, %v753_v2  ;;  %754 = vst.msk [vmem:[%s320_s4] sm:$0xff] %vm549_vm2, %v750_v3 }
 0x261   : > { %756 = vst.msk [vmem:[%s320_s4 + $0x10] sm:$0xff] %vm549_vm2, %v752_v5 }
 0x262 PF: > { %s13_s14 = sadd.s32 1, %s1022_s14   ;;  %s1117_s12 = smov %s1018_s13 }
 0x263   : > { %p10_p5 = scmp.ge.s32.totalorder %s13_s14, 4   ;;  %s1118_s13 = smov %s1120_s15 }
 0x265   :  { %12 = sbr.rel (!%p10_p5) target bundleno = 2 (0x2), region = 68 }

</bundles_post_ra>
